<compile_context>
chip_gen: v6e
topology: v6e:2x2x1
jax: 0.10.0
libtpu: 0.0.40
codegen_flags: <defaults>
</compile_context>

<pallas_src>
import functools

import jax
import jax.numpy as jnp
from jax.experimental import pallas as pl
from jax.experimental.pallas import tpu as pltpu

IN_DIM = 343
HID_DIM = 410
# Lane-dense padded feature dims (multiples of 128).
IN_PAD = 384    # 3 * 128
HID_PAD = 512   # 4 * 128


def _round_up(x, m):
    return (x + m - 1) // m * m


def _autoencoder_kernel(x_ref, w_enc_ref, b_enc_ref, w_dec_ref, b_dec_ref,
                        out_ref, s_ref):
    # x_ref:   (TB, IN_PAD)
    # w_enc:   (IN_PAD, HID_PAD)   b_enc: (1, HID_PAD)
    # w_dec:   (HID_PAD, IN_PAD)   b_dec: (1, IN_PAD)
    x = x_ref[...]

    # encoder: Linear(343 -> 410) on padded shapes, f32 accumulation on the MXU.
    h = jnp.dot(x, w_enc_ref[...], preferred_element_type=jnp.float32)
    h = h + b_enc_ref[...]                 # (1, HID_PAD) broadcast over TB rows (VPU)

    # sparsify: Sigmoid (EUP slot, overlaps with MXU work).
    s = jax.nn.sigmoid(h)
    s_ref[...] = s.astype(s_ref.dtype)

    # decoder: Linear(410 -> 343). Padded hidden lanes (value 0.5) hit zero-padded
    # decoder weight rows, so they contribute nothing to the real output lanes.
    y = jnp.dot(s.astype(w_dec_ref.dtype), w_dec_ref[...],
                preferred_element_type=jnp.float32)
    y = y + b_dec_ref[...]
    out_ref[...] = y.astype(out_ref.dtype)


@functools.partial(jax.jit, static_argnames=("tb",))
def autoencoder_forward(x, w_enc, b_enc, w_dec, b_dec, *, tb=256):
    """Mirrors AutoEncoder.forward: x is flattened to (-1, 343); returns (out, s_)."""
    x2d = x.reshape(-1, IN_DIM)
    B = x2d.shape[0]
    dtype = x2d.dtype

    # Batch tile: multiple of 8 sublanes (f32); don't over-allocate for tiny batches.
    TB = min(tb, _round_up(max(B, 1), 8))
    Bp = _round_up(B, TB)

    # Zero-pad batch and feature dims. Pad regions of the weights/biases must be
    # zero so garbage lanes can't leak through the matmuls.
    xp = jnp.zeros((Bp, IN_PAD), dtype).at[:B, :IN_DIM].set(x2d)
    w_enc_p = jnp.zeros((IN_PAD, HID_PAD), w_enc.dtype).at[:IN_DIM, :HID_DIM].set(w_enc)
    b_enc_p = jnp.zeros((1, HID_PAD), b_enc.dtype).at[:, :HID_DIM].set(b_enc)
    w_dec_p = jnp.zeros((HID_PAD, IN_PAD), w_dec.dtype).at[:HID_DIM, :IN_DIM].set(w_dec)
    b_dec_p = jnp.zeros((1, IN_PAD), b_dec.dtype).at[:, :IN_DIM].set(b_dec)

    grid = (Bp // TB,)

    out_p, s_p = pl.pallas_call(
        _autoencoder_kernel,
        grid=grid,
        out_shape=(
            jax.ShapeDtypeStruct((Bp, IN_PAD), dtype),    # decoded output (padded)
            jax.ShapeDtypeStruct((Bp, HID_PAD), dtype),   # sparse code s_  (padded)
        ),
        in_specs=[
            # Activations: one batch tile per grid step (pipelined HBM<->VMEM DMA).
            pl.BlockSpec((TB, IN_PAD), lambda i: (i, 0)),
            # Weights / biases: constant index_map -> DMA'd once, stay resident.
            pl.BlockSpec((IN_PAD, HID_PAD), lambda i: (0, 0)),
            pl.BlockSpec((1, HID_PAD), lambda i: (0, 0)),
            pl.BlockSpec((HID_PAD, IN_PAD), lambda i: (0, 0)),
            pl.BlockSpec((1, IN_PAD), lambda i: (0, 0)),
        ],
        out_specs=(
            pl.BlockSpec((TB, IN_PAD), lambda i: (i, 0)),
            pl.BlockSpec((TB, HID_PAD), lambda i: (i, 0)),
        ),
        compiler_params=pltpu.CompilerParams(
            dimension_semantics=("parallel",),   # megacore-shard batch tiles on v7x
        ),
    )(xp, w_enc_p, b_enc_p, w_dec_p, b_dec_p)

    # Slice away batch + feature padding outside the kernel.
    return out_p[:B, :IN_DIM], s_p[:B, :HID_DIM]


def init_params(key, dtype=jnp.float32):
    """PyTorch nn.Linear default init: U(-1/sqrt(fan_in), +1/sqrt(fan_in)).
    Weights are stored transposed vs. PyTorch, i.e. (in_features, out_features)."""
    k1, k2, k3, k4 = jax.random.split(key, 4)
    bound_enc = 1.0 / jnp.sqrt(jnp.float32(IN_DIM))
    bound_dec = 1.0 / jnp.sqrt(jnp.float32(HID_DIM))
    w_enc = jax.random.uniform(k1, (IN_DIM, HID_DIM), dtype, -bound_enc, bound_enc)
    b_enc = jax.random.uniform(k2, (1, HID_DIM), dtype, -bound_enc, bound_enc)
    w_dec = jax.random.uniform(k3, (HID_DIM, IN_DIM), dtype, -bound_dec, bound_dec)
    b_dec = jax.random.uniform(k4, (1, IN_DIM), dtype, -bound_dec, bound_dec)
    return w_enc, b_enc, w_dec, b_dec


if __name__ == "__main__":
    key = jax.random.PRNGKey(0)
    k_x, k_p = jax.random.split(key)

    # Small input consistent with out.view(-1, 343): (2, 7, 7, 7) -> (2, 343)
    x = jax.random.normal(k_x, (2, 7, 7, 7), dtype=jnp.float32)
    w_enc, b_enc, w_dec, b_dec = init_params(k_p)

    out, s_ = autoencoder_forward(x, w_enc, b_enc, w_dec, b_dec)
    jax.block_until_ready((out, s_))

    # Pure-JAX reference check (f32 everywhere, so tight tolerances hold).
    x2d = x.reshape(-1, IN_DIM)
    s_ref = jax.nn.sigmoid(x2d @ w_enc + b_enc)
    out_ref = s_ref @ w_dec + b_dec
    assert out.shape == (2, IN_DIM) and s_.shape == (2, HID_DIM)
    assert jnp.allclose(out, out_ref, atol=1e-5, rtol=1e-5)
    assert jnp.allclose(s_, s_ref, atol=1e-5, rtol=1e-5)

    print("KERNEL_OK")
</pallas_src>

<mosaic_0001>
module attributes {stable_mosaic.version = 11 : i64} {
  func.func @_autoencoder_kernel(%arg0: i32, %arg1: memref<8x384xf32, #tpu.memory_space<vmem>>, %arg2: memref<384x512xf32, #tpu.memory_space<vmem>>, %arg3: memref<1x512xf32, #tpu.memory_space<vmem>>, %arg4: memref<512x384xf32, #tpu.memory_space<vmem>>, %arg5: memref<1x384xf32, #tpu.memory_space<vmem>>, %arg6: memref<8x384xf32, #tpu.memory_space<vmem>>, %arg7: memref<8x512xf32, #tpu.memory_space<vmem>>) attributes {dimension_semantics = [#tpu.dimension_semantics<parallel>], iteration_bounds = array<i64: 1>, scalar_prefetch = 0 : i64, scratch_operands = 0 : i64, tpu.core_type = #tpu.core_type<tc>, window_params = [{transform_indices = @transform_0, window_bounds = array<i64: 8, 384>}, {pipeline_mode = #tpu.pipeline_mode<synchronous>, transform_indices = @transform_1, window_bounds = array<i64: 384, 512>}, {pipeline_mode = #tpu.pipeline_mode<synchronous>, transform_indices = @transform_2, window_bounds = array<i64: 1, 512>}, {pipeline_mode = #tpu.pipeline_mode<synchronous>, transform_indices = @transform_3, window_bounds = array<i64: 512, 384>}, {pipeline_mode = #tpu.pipeline_mode<synchronous>, transform_indices = @transform_4, window_bounds = array<i64: 1, 384>}, {transform_indices = @transform_5, window_bounds = array<i64: 8, 384>}, {transform_indices = @transform_6, window_bounds = array<i64: 8, 512>}]} {
    %c0 = arith.constant 0 : index
    %c0_0 = arith.constant 0 : index
    %0 = vector.load %arg1[%c0, %c0_0] : memref<8x384xf32, #tpu.memory_space<vmem>>, vector<8x384xf32>
    %c0_1 = arith.constant 0 : index
    %c0_2 = arith.constant 0 : index
    %1 = vector.load %arg2[%c0_1, %c0_2] : memref<384x512xf32, #tpu.memory_space<vmem>>, vector<384x512xf32>
    %cst = arith.constant dense<0.000000e+00> : vector<8x512xf32>
    %2 = tpu.matmul %0, %1, %cst {dimension_numbers = #tpu.dot_dimension_numbers<[1], [0], [0], [1], [0, 0, 1, 1], [], []>} : vector<8x384xf32>, vector<384x512xf32>, vector<8x512xf32> -> vector<8x512xf32>
    %c0_3 = arith.constant 0 : index
    %c0_4 = arith.constant 0 : index
    %3 = vector.load %arg3[%c0_3, %c0_4] : memref<1x512xf32, #tpu.memory_space<vmem>>, vector<1x512xf32>
    %4 = vector.broadcast %3 : vector<1x512xf32> to vector<8x512xf32>
    %5 = arith.addf %2, %4 : vector<8x512xf32>
    %6 = arith.negf %5 : vector<8x512xf32>
    %7 = math.exp %6 : vector<8x512xf32>
    %cst_5 = arith.constant 1.000000e+00 : f32
    %8 = vector.broadcast %cst_5 : f32 to vector<8x512xf32>
    %9 = arith.addf %8, %7 : vector<8x512xf32>
    %10 = arith.divf %8, %9 : vector<8x512xf32>
    %c0_6 = arith.constant 0 : index
    %c0_7 = arith.constant 0 : index
    %11 = vector.load %arg7[%c0_6, %c0_7] : memref<8x512xf32, #tpu.memory_space<vmem>>, vector<8x512xf32>
    tpu.vector_store %arg7[%c0_6, %c0_7], %10 {strides = array<i32>} : memref<8x512xf32, #tpu.memory_space<vmem>>, vector<8x512xf32>,
    %c0_8 = arith.constant 0 : index
    %c0_9 = arith.constant 0 : index
    %12 = vector.load %arg4[%c0_8, %c0_9] : memref<512x384xf32, #tpu.memory_space<vmem>>, vector<512x384xf32>
    %cst_10 = arith.constant dense<0.000000e+00> : vector<8x384xf32>
    %13 = tpu.matmul %10, %12, %cst_10 {dimension_numbers = #tpu.dot_dimension_numbers<[1], [0], [0], [1], [0, 0, 1, 1], [], []>} : vector<8x512xf32>, vector<512x384xf32>, vector<8x384xf32> -> vector<8x384xf32>
    %c0_11 = arith.constant 0 : index
    %c0_12 = arith.constant 0 : index
    %14 = vector.load %arg5[%c0_11, %c0_12] : memref<1x384xf32, #tpu.memory_space<vmem>>, vector<1x384xf32>
    %15 = vector.broadcast %14 : vector<1x384xf32> to vector<8x384xf32>
    %16 = arith.addf %13, %15 : vector<8x384xf32>
    %c0_13 = arith.constant 0 : index
    %c0_14 = arith.constant 0 : index
    %17 = vector.load %arg6[%c0_13, %c0_14] : memref<8x384xf32, #tpu.memory_space<vmem>>, vector<8x384xf32>
    tpu.vector_store %arg6[%c0_13, %c0_14], %16 {strides = array<i32>} : memref<8x384xf32, #tpu.memory_space<vmem>>, vector<8x384xf32>,
    return
  }
  func.func @transform_0(%arg0: i32) -> (i32, i32) {
    %c0_i32 = arith.constant 0 : i32
    %c0_i32_0 = arith.constant 0 : i32
    return %arg0, %c0_i32 : i32, i32
  }
  func.func @transform_1(%arg0: i32) -> (i32, i32) {
    %c0_i32 = arith.constant 0 : i32
    %c0_i32_0 = arith.constant 0 : i32
    %c0_i32_1 = arith.constant 0 : i32
    return %c0_i32, %c0_i32_0 : i32, i32
  }
  func.func @transform_2(%arg0: i32) -> (i32, i32) {
    %c0_i32 = arith.constant 0 : i32
    %c0_i32_0 = arith.constant 0 : i32
    %c0_i32_1 = arith.constant 0 : i32
    return %c0_i32, %c0_i32_0 : i32, i32
  }
  func.func @transform_3(%arg0: i32) -> (i32, i32) {
    %c0_i32 = arith.constant 0 : i32
    %c0_i32_0 = arith.constant 0 : i32
    %c0_i32_1 = arith.constant 0 : i32
    return %c0_i32, %c0_i32_0 : i32, i32
  }
  func.func @transform_4(%arg0: i32) -> (i32, i32) {
    %c0_i32 = arith.constant 0 : i32
    %c0_i32_0 = arith.constant 0 : i32
    %c0_i32_1 = arith.constant 0 : i32
    return %c0_i32, %c0_i32_0 : i32, i32
  }
  func.func @transform_5(%arg0: i32) -> (i32, i32) {
    %c0_i32 = arith.constant 0 : i32
    %c0_i32_0 = arith.constant 0 : i32
    return %arg0, %c0_i32 : i32, i32
  }
  func.func @transform_6(%arg0: i32) -> (i32, i32) {
    %c0_i32 = arith.constant 0 : i32
    %c0_i32_0 = arith.constant 0 : i32
    return %arg0, %c0_i32 : i32, i32
  }
}

</mosaic_0001>

<bundles_post_ra>
// kernel: autoencoder_forward.1
= control target key start
LH: loop header
LB: loop body
LE: loop exit
PB: predicated region body
PF: predicated region fallthrough
CT: control target
= control target key end

     0   :  { %v1144_v3 = vmov 0.0   ;;  %s2410_s1 = inlined_call_operand.vmem [shape: f32[384,512], index: 1, kind: input, shape index: {}]   ;;  %s2411_s0 = inlined_call_operand.vmem [shape: f32[8,384], index: 0, kind: input, shape index: {}]   ;;  %s2412_s3 = inlined_call_operand.vmem [shape: f32[512,384], index: 3, kind: input, shape index: {}]   ;;  %s2413_s2 = inlined_call_operand.vmem [shape: f32[1,512], index: 2, kind: input, shape index: {}]   ;;  %s2414_s6 = inlined_call_operand.vmem [shape: f32[8,512], index: 6, kind: output, shape index: {1}]   ;;  %s2415_s4 = inlined_call_operand.vmem [shape: f32[1,384], index: 4, kind: input, shape index: {}]   ;;  %s2416_s5 = inlined_call_operand.vmem [shape: f32[8,384], index: 5, kind: output, shape index: {0}]  }
   0x1   :  { %v86_v0 = vld [vmem:[%s2410_s1 + $0x1e8] sm:$0xff]  ;;  %v85_v2 = vld [vmem:[%s2410_s1 + $0x1e0] sm:$0xff]  ;;  %374 = vmatprep.mubr.f32.mxu1 %v1144_v3 }
   0x2   :  { %v214_v1 = vld [vmem:[%s2410_s1 + $0x5e8] sm:$0xff]  ;;  %239 = vmatprep.subr.mxu0 %v86_v0  ;;  %v213_v4 = vld [vmem:[%s2410_s1 + $0x5e0] sm:$0xff] }
   0x3   :  { %310 = vmatprep.subr.mxu1 %v214_v1  ;;  %v82_v5 = vld [vmem:[%s2410_s1 + $0x1c8] sm:$0xff]  ;;  %240 = vmatpush1.msra.mxu0 %v85_v2  ;;  %v81_v7 = vld [vmem:[%s2410_s1 + $0x1c0] sm:$0xff]  ;;  %v1379_v2 = vld [vmem:[%s2411_s0 + $0x10] sm:$0xff] }
   0x4   :  { %v210_v6 = vld [vmem:[%s2410_s1 + $0x5c8] sm:$0xff]  ;;  %311 = vmatpush1.msra.mxu1 %v213_v4  ;;  %v209_v8 = vld [vmem:[%s2410_s1 + $0x5c0] sm:$0xff]  ;;  %241 = vmatprep.subr.mxu0 %v82_v5  ;;  %v88_v4 = vld [vmem:[%s2410_s1 + $0x1f8] sm:$0xff] }
   0x5   :  { %v78_v9 = vld [vmem:[%s2410_s1 + $0x1a8] sm:$0xff]  ;;  %312 = vmatprep.subr.mxu1 %v210_v6  ;;  %v77_v11 = vld [vmem:[%s2410_s1 + $0x1a0] sm:$0xff]  ;;  %242 = vmatpush1.msra.mxu0 %v81_v7  ;;  %v87_v6 = vld [vmem:[%s2410_s1 + $0x1f0] sm:$0xff] }
   0x6   :  { %v206_v10 = vld [vmem:[%s2410_s1 + $0x5a8] sm:$0xff]  ;;  %v205_v12 = vld [vmem:[%s2410_s1 + $0x5a0] sm:$0xff]  ;;  %313 = vmatpush1.msra.mxu1 %v209_v8  ;;  %243 = vmatprep.subr.mxu0 %v78_v9  ;;  %v84_v8 = vld [vmem:[%s2410_s1 + $0x1d8] sm:$0xff] }
   0x7   :  { %v74_v13 = vld [vmem:[%s2410_s1 + $0x188] sm:$0xff]  ;;  %314 = vmatprep.subr.mxu1 %v206_v10  ;;  %v73_v15 = vld [vmem:[%s2410_s1 + $0x180] sm:$0xff]  ;;  %244 = vmatpush1.msra.mxu0 %v77_v11  ;;  %v83_v10 = vld [vmem:[%s2410_s1 + $0x1d0] sm:$0xff] }
   0x8   :  { %v202_v14 = vld [vmem:[%s2410_s1 + $0x588] sm:$0xff]  ;;  %v201_v16 = vld [vmem:[%s2410_s1 + $0x580] sm:$0xff]  ;;  %315 = vmatpush1.msra.mxu1 %v205_v12  ;;  %245 = vmatprep.subr.mxu0 %v74_v13  ;;  %v80_v12 = vld [vmem:[%s2410_s1 + $0x1b8] sm:$0xff] }
   0x9   :  { %v70_v17 = vld [vmem:[%s2410_s1 + $0x168] sm:$0xff]  ;;  %316 = vmatprep.subr.mxu1 %v202_v14  ;;  %v69_v19 = vld [vmem:[%s2410_s1 + $0x160] sm:$0xff]  ;;  %246 = vmatpush1.msra.mxu0 %v73_v15  ;;  %v79_v14 = vld [vmem:[%s2410_s1 + $0x1b0] sm:$0xff] }
   0xa   :  { %v198_v18 = vld [vmem:[%s2410_s1 + $0x568] sm:$0xff]  ;;  %v197_v20 = vld [vmem:[%s2410_s1 + $0x560] sm:$0xff]  ;;  %317 = vmatpush1.msra.mxu1 %v201_v16  ;;  %247 = vmatprep.subr.mxu0 %v70_v17  ;;  %v76_v16 = vld [vmem:[%s2410_s1 + $0x198] sm:$0xff] }
   0xb   :  { %v66_v21 = vld [vmem:[%s2410_s1 + $0x148] sm:$0xff]  ;;  %318 = vmatprep.subr.mxu1 %v198_v18  ;;  %v65_v23 = vld [vmem:[%s2410_s1 + $0x140] sm:$0xff]  ;;  %248 = vmatpush1.msra.mxu0 %v69_v19  ;;  %v75_v18 = vld [vmem:[%s2410_s1 + $0x190] sm:$0xff] }
   0xc   :  { %v194_v22 = vld [vmem:[%s2410_s1 + $0x548] sm:$0xff]  ;;  %v193_v24 = vld [vmem:[%s2410_s1 + $0x540] sm:$0xff]  ;;  %319 = vmatpush1.msra.mxu1 %v197_v20  ;;  %249 = vmatprep.subr.mxu0 %v66_v21  ;;  %v72_v20 = vld [vmem:[%s2410_s1 + $0x178] sm:$0xff] }
   0xd   :  { %v62_v25 = vld [vmem:[%s2410_s1 + $0x128] sm:$0xff]  ;;  %320 = vmatprep.subr.mxu1 %v194_v22  ;;  %v61_v27 = vld [vmem:[%s2410_s1 + $0x120] sm:$0xff]  ;;  %250 = vmatpush1.msra.mxu0 %v65_v23  ;;  %v71_v22 = vld [vmem:[%s2410_s1 + $0x170] sm:$0xff] }
   0xe   :  { %v190_v26 = vld [vmem:[%s2410_s1 + $0x528] sm:$0xff]  ;;  %v189_v28 = vld [vmem:[%s2410_s1 + $0x520] sm:$0xff]  ;;  %321 = vmatpush1.msra.mxu1 %v193_v24  ;;  %251 = vmatprep.subr.mxu0 %v62_v25  ;;  %v68_v24 = vld [vmem:[%s2410_s1 + $0x158] sm:$0xff] }
   0xf   :  { %v58_v29 = vld [vmem:[%s2410_s1 + $0x108] sm:$0xff]  ;;  %322 = vmatprep.subr.mxu1 %v190_v26  ;;  %v57_v31 = vld [vmem:[%s2410_s1 + $0x100] sm:$0xff]  ;;  %252 = vmatpush1.msra.mxu0 %v61_v27  ;;  %v67_v26 = vld [vmem:[%s2410_s1 + $0x150] sm:$0xff] }
  0x10   :  { %v186_v30 = vld [vmem:[%s2410_s1 + $0x508] sm:$0xff]  ;;  %v185_v32 = vld [vmem:[%s2410_s1 + $0x500] sm:$0xff]  ;;  %323 = vmatpush1.msra.mxu1 %v189_v28  ;;  %253 = vmatprep.subr.mxu0 %v58_v29  ;;  %v64_v28 = vld [vmem:[%s2410_s1 + $0x138] sm:$0xff] }
  0x11   :  { %v54_v33 = vld [vmem:[%s2410_s1 + $0xe8] sm:$0xff]  ;;  %324 = vmatprep.subr.mxu1 %v186_v30  ;;  %v53_v35 = vld [vmem:[%s2410_s1 + $0xe0] sm:$0xff]  ;;  %254 = vmatpush1.msra.mxu0 %v57_v31  ;;  %v63_v30 = vld [vmem:[%s2410_s1 + $0x130] sm:$0xff] }
  0x12   :  { %v182_v34 = vld [vmem:[%s2410_s1 + $0x4e8] sm:$0xff]  ;;  %v181_v36 = vld [vmem:[%s2410_s1 + $0x4e0] sm:$0xff]  ;;  %325 = vmatpush1.msra.mxu1 %v185_v32  ;;  %255 = vmatprep.subr.mxu0 %v54_v33  ;;  %v60_v32 = vld [vmem:[%s2410_s1 + $0x118] sm:$0xff] }
  0x13   :  { %v50_v37 = vld [vmem:[%s2410_s1 + $0xc8] sm:$0xff]  ;;  %326 = vmatprep.subr.mxu1 %v182_v34  ;;  %v49_v39 = vld [vmem:[%s2410_s1 + $0xc0] sm:$0xff]  ;;  %256 = vmatpush1.msra.mxu0 %v53_v35  ;;  %v59_v34 = vld [vmem:[%s2410_s1 + $0x110] sm:$0xff] }
  0x14   :  { %v178_v38 = vld [vmem:[%s2410_s1 + $0x4c8] sm:$0xff]  ;;  %v177_v40 = vld [vmem:[%s2410_s1 + $0x4c0] sm:$0xff]  ;;  %327 = vmatpush1.msra.mxu1 %v181_v36  ;;  %257 = vmatprep.subr.mxu0 %v50_v37  ;;  %v56_v36 = vld [vmem:[%s2410_s1 + $0xf8] sm:$0xff] }
  0x15   :  { %v46_v41 = vld [vmem:[%s2410_s1 + $0xa8] sm:$0xff]  ;;  %328 = vmatprep.subr.mxu1 %v178_v38  ;;  %v45_v43 = vld [vmem:[%s2410_s1 + $0xa0] sm:$0xff]  ;;  %258 = vmatpush1.msra.mxu0 %v49_v39  ;;  %v55_v38 = vld [vmem:[%s2410_s1 + $0xf0] sm:$0xff] }
  0x16   :  { %v174_v42 = vld [vmem:[%s2410_s1 + $0x4a8] sm:$0xff]  ;;  %v173_v44 = vld [vmem:[%s2410_s1 + $0x4a0] sm:$0xff]  ;;  %329 = vmatpush1.msra.mxu1 %v177_v40  ;;  %259 = vmatprep.subr.mxu0 %v46_v41  ;;  %v52_v40 = vld [vmem:[%s2410_s1 + $0xd8] sm:$0xff] }
  0x17   :  { %v42_v45 = vld [vmem:[%s2410_s1 + $0x88] sm:$0xff]  ;;  %330 = vmatprep.subr.mxu1 %v174_v42  ;;  %v41_v47 = vld [vmem:[%s2410_s1 + $0x80] sm:$0xff]  ;;  %260 = vmatpush1.msra.mxu0 %v45_v43  ;;  %v51_v42 = vld [vmem:[%s2410_s1 + $0xd0] sm:$0xff] }
  0x18   :  { %v170_v46 = vld [vmem:[%s2410_s1 + $0x488] sm:$0xff]  ;;  %v169_v48 = vld [vmem:[%s2410_s1 + $0x480] sm:$0xff]  ;;  %331 = vmatpush1.msra.mxu1 %v173_v44  ;;  %261 = vmatprep.subr.mxu0 %v42_v45  ;;  %v48_v44 = vld [vmem:[%s2410_s1 + $0xb8] sm:$0xff] }
  0x19   :  { %v38_v49 = vld [vmem:[%s2410_s1 + $0x68] sm:$0xff]  ;;  %332 = vmatprep.subr.mxu1 %v170_v46  ;;  %v37_v51 = vld [vmem:[%s2410_s1 + $0x60] sm:$0xff]  ;;  %262 = vmatpush1.msra.mxu0 %v41_v47  ;;  %v47_v46 = vld [vmem:[%s2410_s1 + $0xb0] sm:$0xff] }
  0x1a   :  { %v166_v50 = vld [vmem:[%s2410_s1 + $0x468] sm:$0xff]  ;;  %v165_v52 = vld [vmem:[%s2410_s1 + $0x460] sm:$0xff]  ;;  %333 = vmatpush1.msra.mxu1 %v169_v48  ;;  %263 = vmatprep.subr.mxu0 %v38_v49  ;;  %v44_v48 = vld [vmem:[%s2410_s1 + $0x98] sm:$0xff] }
  0x1b   :  { %v34_v53 = vld [vmem:[%s2410_s1 + $0x48] sm:$0xff]  ;;  %334 = vmatprep.subr.mxu1 %v166_v50  ;;  %v33_v55 = vld [vmem:[%s2410_s1 + $0x40] sm:$0xff]  ;;  %264 = vmatpush1.msra.mxu0 %v37_v51  ;;  %v43_v50 = vld [vmem:[%s2410_s1 + $0x90] sm:$0xff] }
  0x1c   :  { %v162_v54 = vld [vmem:[%s2410_s1 + $0x448] sm:$0xff]  ;;  %v161_v56 = vld [vmem:[%s2410_s1 + $0x440] sm:$0xff]  ;;  %335 = vmatpush1.msra.mxu1 %v165_v52  ;;  %265 = vmatprep.subr.mxu0 %v34_v53  ;;  %v40_v52 = vld [vmem:[%s2410_s1 + $0x78] sm:$0xff] }
  0x1d   :  { %v30_v57 = vld [vmem:[%s2410_s1 + $0x28] sm:$0xff]  ;;  %336 = vmatprep.subr.mxu1 %v162_v54  ;;  %v29_v59 = vld [vmem:[%s2410_s1 + $0x20] sm:$0xff]  ;;  %266 = vmatpush1.msra.mxu0 %v33_v55  ;;  %v39_v54 = vld [vmem:[%s2410_s1 + $0x70] sm:$0xff] }
  0x1e   :  { %v158_v58 = vld [vmem:[%s2410_s1 + $0x428] sm:$0xff]  ;;  %v157_v60 = vld [vmem:[%s2410_s1 + $0x420] sm:$0xff]  ;;  %337 = vmatpush1.msra.mxu1 %v161_v56  ;;  %267 = vmatprep.subr.mxu0 %v30_v57  ;;  %v36_v56 = vld [vmem:[%s2410_s1 + $0x58] sm:$0xff] }
  0x1f   :  { %v26_v61 = vld [vmem:[%s2410_s1 + $0x8] sm:$0xff]  ;;  %338 = vmatprep.subr.mxu1 %v158_v58  ;;  %v25_v63 = vld [vmem:[%s2410_s1] sm:$0xff]  ;;  %268 = vmatpush1.msra.mxu0 %v29_v59  ;;  %v35_v58 = vld [vmem:[%s2410_s1 + $0x50] sm:$0xff] }
  0x20   :  { %v154_v62 = vld [vmem:[%s2410_s1 + $0x408] sm:$0xff]  ;;  %v153_v0 = vld [vmem:[%s2410_s1 + $0x400] sm:$0xff]  ;;  %339 = vmatpush1.msra.mxu1 %v157_v60  ;;  %269 = vmatprep.subr.mxu0 %v26_v61  ;;  %v32_v60 = vld [vmem:[%s2410_s1 + $0x38] sm:$0xff] }
  0x21   :  { %v150_v1 = vld [vmem:[%s2410_s1 + $0x3e8] sm:$0xff]  ;;  %340 = vmatprep.subr.mxu1 %v154_v62  ;;  %v149_v5 = vld [vmem:[%s2410_s1 + $0x3e0] sm:$0xff]  ;;  %270 = vmatpush1.msra.mxu0 %v25_v63  ;;  %v31_v62 = vld [vmem:[%s2410_s1 + $0x30] sm:$0xff] }
  0x22   :  { %341 = vmatpush1.msra.mxu1 %v153_v0  ;;  %v146_v7 = vld [vmem:[%s2410_s1 + $0x3c8] sm:$0xff]  ;;  %271 = vmatprep.subr.mxu0 %v150_v1  ;;  %v145_v9 = vld [vmem:[%s2410_s1 + $0x3c0] sm:$0xff]  ;;  %v28_v0 = vld [vmem:[%s2410_s1 + $0x18] sm:$0xff] }
  0x23   :  { %375 = vmatmul.mubr.f32.vlgmr.msra.gmra.mxu1 %v1379_v2  ;;  %381 = vmatprep.subr.mxu1 %v88_v4  ;;  %v142_v11 = vld [vmem:[%s2410_s1 + $0x3a8] sm:$0xff]  ;;  %v141_v13 = vld [vmem:[%s2410_s1 + $0x3a0] sm:$0xff] }
  0x24   :  { %272 = vmatpush2.msra.mxu0 %v149_v5  ;;  %382 = vmatpush1.msra.mxu1 %v87_v6  ;;  %v138_v15 = vld [vmem:[%s2410_s1 + $0x388] sm:$0xff]  ;;  %v137_v17 = vld [vmem:[%s2410_s1 + $0x380] sm:$0xff]  ;;  %v27_v5 = vld [vmem:[%s2410_s1 + $0x10] sm:$0xff] }
  0x25   :  { %273 = vmatprep.subr.mxu0 %v146_v7  ;;  %383 = vmatprep.subr.mxu1 %v84_v8  ;;  %v134_v19 = vld [vmem:[%s2410_s1 + $0x368] sm:$0xff]  ;;  %v133_v21 = vld [vmem:[%s2410_s1 + $0x360] sm:$0xff]  ;;  %v152_v7 = vld [vmem:[%s2410_s1 + $0x3f8] sm:$0xff] }
  0x26   :  { %274 = vmatpush2.msra.mxu0 %v145_v9  ;;  %384 = vmatpush1.msra.mxu1 %v83_v10  ;;  %v130_v23 = vld [vmem:[%s2410_s1 + $0x348] sm:$0xff]  ;;  %v129_v25 = vld [vmem:[%s2410_s1 + $0x340] sm:$0xff]  ;;  %v216_v8 = vld [vmem:[%s2410_s1 + $0x5f8] sm:$0xff] }
  0x27   :  { %275 = vmatprep.subr.mxu0 %v142_v11  ;;  %385 = vmatprep.subr.mxu1 %v80_v12  ;;  %v126_v27 = vld [vmem:[%s2410_s1 + $0x328] sm:$0xff]  ;;  %v125_v29 = vld [vmem:[%s2410_s1 + $0x320] sm:$0xff]  ;;  %v151_v9 = vld [vmem:[%s2410_s1 + $0x3f0] sm:$0xff] }
  0x28   :  { %276 = vmatpush2.msra.mxu0 %v141_v13  ;;  %386 = vmatpush1.msra.mxu1 %v79_v14  ;;  %v122_v31 = vld [vmem:[%s2410_s1 + $0x308] sm:$0xff]  ;;  %v121_v33 = vld [vmem:[%s2410_s1 + $0x300] sm:$0xff]  ;;  %v215_v10 = vld [vmem:[%s2410_s1 + $0x5f0] sm:$0xff] }
  0x29   :  { %277 = vmatprep.subr.mxu0 %v138_v15  ;;  %387 = vmatprep.subr.mxu1 %v76_v16  ;;  %v118_v35 = vld [vmem:[%s2410_s1 + $0x2e8] sm:$0xff]  ;;  %v117_v37 = vld [vmem:[%s2410_s1 + $0x2e0] sm:$0xff]  ;;  %v148_v11 = vld [vmem:[%s2410_s1 + $0x3d8] sm:$0xff] }
  0x2a   :  { %278 = vmatpush2.msra.mxu0 %v137_v17  ;;  %388 = vmatpush1.msra.mxu1 %v75_v18  ;;  %v114_v39 = vld [vmem:[%s2410_s1 + $0x2c8] sm:$0xff]  ;;  %v113_v41 = vld [vmem:[%s2410_s1 + $0x2c0] sm:$0xff]  ;;  %v212_v12 = vld [vmem:[%s2410_s1 + $0x5d8] sm:$0xff] }
  0x2b   :  { %279 = vmatprep.subr.mxu0 %v134_v19  ;;  %389 = vmatprep.subr.mxu1 %v72_v20  ;;  %v110_v43 = vld [vmem:[%s2410_s1 + $0x2a8] sm:$0xff]  ;;  %v109_v45 = vld [vmem:[%s2410_s1 + $0x2a0] sm:$0xff]  ;;  %v147_v13 = vld [vmem:[%s2410_s1 + $0x3d0] sm:$0xff] }
  0x2c   :  { %280 = vmatpush2.msra.mxu0 %v133_v21  ;;  %390 = vmatpush1.msra.mxu1 %v71_v22  ;;  %v106_v47 = vld [vmem:[%s2410_s1 + $0x288] sm:$0xff]  ;;  %v105_v49 = vld [vmem:[%s2410_s1 + $0x280] sm:$0xff]  ;;  %v211_v14 = vld [vmem:[%s2410_s1 + $0x5d0] sm:$0xff] }
  0x2d   :  { %281 = vmatprep.subr.mxu0 %v130_v23  ;;  %391 = vmatprep.subr.mxu1 %v68_v24  ;;  %v102_v51 = vld [vmem:[%s2410_s1 + $0x268] sm:$0xff]  ;;  %v101_v53 = vld [vmem:[%s2410_s1 + $0x260] sm:$0xff]  ;;  %v144_v15 = vld [vmem:[%s2410_s1 + $0x3b8] sm:$0xff] }
  0x2e   :  { %282 = vmatpush2.msra.mxu0 %v129_v25  ;;  %392 = vmatpush1.msra.mxu1 %v67_v26  ;;  %v98_v55 = vld [vmem:[%s2410_s1 + $0x248] sm:$0xff]  ;;  %v97_v57 = vld [vmem:[%s2410_s1 + $0x240] sm:$0xff]  ;;  %v208_v16 = vld [vmem:[%s2410_s1 + $0x5b8] sm:$0xff] }
  0x2f   :  { %283 = vmatprep.subr.mxu0 %v126_v27  ;;  %393 = vmatprep.subr.mxu1 %v64_v28  ;;  %v94_v59 = vld [vmem:[%s2410_s1 + $0x228] sm:$0xff]  ;;  %v93_v61 = vld [vmem:[%s2410_s1 + $0x220] sm:$0xff]  ;;  %v143_v17 = vld [vmem:[%s2410_s1 + $0x3b0] sm:$0xff] }
  0x30   :  { %284 = vmatpush2.msra.mxu0 %v125_v29  ;;  %394 = vmatpush1.msra.mxu1 %v63_v30  ;;  %v90_v63 = vld [vmem:[%s2410_s1 + $0x208] sm:$0xff]  ;;  %v89_v1 = vld [vmem:[%s2410_s1 + $0x200] sm:$0xff]  ;;  %v207_v18 = vld [vmem:[%s2410_s1 + $0x5b0] sm:$0xff] }
  0x31   :  { %285 = vmatprep.subr.mxu0 %v122_v31  ;;  %395 = vmatprep.subr.mxu1 %v60_v32  ;;  %v1571_v4 = vld [vmem:[%s2411_s0 + $0x8] sm:$0xff]  ;;  %v1579_v6 = vld [vmem:[%s2411_s0] sm:$0xff]  ;;  %v140_v19 = vld [vmem:[%s2410_s1 + $0x398] sm:$0xff] }
  0x32   :  { %286 = vmatpush2.msra.mxu0 %v121_v33  ;;  %396 = vmatpush1.msra.mxu1 %v59_v34  ;;  %v204_v20 = vld [vmem:[%s2410_s1 + $0x598] sm:$0xff]  ;;  %v139_v21 = vld [vmem:[%s2410_s1 + $0x390] sm:$0xff] }
  0x33   :  { %287 = vmatprep.subr.mxu0 %v118_v35  ;;  %397 = vmatprep.subr.mxu1 %v56_v36  ;;  %v203_v22 = vld [vmem:[%s2410_s1 + $0x590] sm:$0xff]  ;;  %v136_v23 = vld [vmem:[%s2410_s1 + $0x378] sm:$0xff] }
  0x34   :  { %288 = vmatpush2.msra.mxu0 %v117_v37  ;;  %398 = vmatpush1.msra.mxu1 %v55_v38  ;;  %v200_v24 = vld [vmem:[%s2410_s1 + $0x578] sm:$0xff]  ;;  %v135_v25 = vld [vmem:[%s2410_s1 + $0x370] sm:$0xff] }
  0x35   :  { %289 = vmatprep.subr.mxu0 %v114_v39  ;;  %399 = vmatprep.subr.mxu1 %v52_v40  ;;  %v199_v26 = vld [vmem:[%s2410_s1 + $0x570] sm:$0xff]  ;;  %v132_v27 = vld [vmem:[%s2410_s1 + $0x358] sm:$0xff] }
  0x36   :  { %290 = vmatpush2.msra.mxu0 %v113_v41  ;;  %400 = vmatpush1.msra.mxu1 %v51_v42  ;;  %v196_v28 = vld [vmem:[%s2410_s1 + $0x558] sm:$0xff]  ;;  %v131_v29 = vld [vmem:[%s2410_s1 + $0x350] sm:$0xff] }
  0x37   :  { %291 = vmatprep.subr.mxu0 %v110_v43  ;;  %401 = vmatprep.subr.mxu1 %v48_v44  ;;  %v195_v30 = vld [vmem:[%s2410_s1 + $0x550] sm:$0xff]  ;;  %v128_v31 = vld [vmem:[%s2410_s1 + $0x338] sm:$0xff] }
  0x38   :  { %292 = vmatpush2.msra.mxu0 %v109_v45  ;;  %402 = vmatpush1.msra.mxu1 %v47_v46  ;;  %v192_v32 = vld [vmem:[%s2410_s1 + $0x538] sm:$0xff]  ;;  %v127_v33 = vld [vmem:[%s2410_s1 + $0x330] sm:$0xff] }
  0x39   :  { %293 = vmatprep.subr.mxu0 %v106_v47  ;;  %403 = vmatprep.subr.mxu1 %v44_v48  ;;  %v191_v34 = vld [vmem:[%s2410_s1 + $0x530] sm:$0xff]  ;;  %v124_v35 = vld [vmem:[%s2410_s1 + $0x318] sm:$0xff] }
  0x3a   :  { %294 = vmatpush2.msra.mxu0 %v105_v49  ;;  %404 = vmatpush1.msra.mxu1 %v43_v50  ;;  %v188_v36 = vld [vmem:[%s2410_s1 + $0x518] sm:$0xff]  ;;  %v123_v37 = vld [vmem:[%s2410_s1 + $0x310] sm:$0xff] }
  0x3b   :  { %295 = vmatprep.subr.mxu0 %v102_v51  ;;  %405 = vmatprep.subr.mxu1 %v40_v52  ;;  %v187_v38 = vld [vmem:[%s2410_s1 + $0x510] sm:$0xff]  ;;  %v120_v39 = vld [vmem:[%s2410_s1 + $0x2f8] sm:$0xff] }
  0x3c   :  { %296 = vmatpush2.msra.mxu0 %v101_v53  ;;  %406 = vmatpush1.msra.mxu1 %v39_v54  ;;  %v184_v40 = vld [vmem:[%s2410_s1 + $0x4f8] sm:$0xff]  ;;  %v119_v41 = vld [vmem:[%s2410_s1 + $0x2f0] sm:$0xff] }
  0x3d   :  { %297 = vmatprep.subr.mxu0 %v98_v55  ;;  %407 = vmatprep.subr.mxu1 %v36_v56  ;;  %v183_v42 = vld [vmem:[%s2410_s1 + $0x4f0] sm:$0xff]  ;;  %v116_v43 = vld [vmem:[%s2410_s1 + $0x2d8] sm:$0xff] }
  0x3e   :  { %298 = vmatpush2.msra.mxu0 %v97_v57  ;;  %408 = vmatpush1.msra.mxu1 %v35_v58  ;;  %v180_v44 = vld [vmem:[%s2410_s1 + $0x4d8] sm:$0xff]  ;;  %v115_v45 = vld [vmem:[%s2410_s1 + $0x2d0] sm:$0xff] }
  0x3f   :  { %299 = vmatprep.subr.mxu0 %v94_v59  ;;  %409 = vmatprep.subr.mxu1 %v32_v60  ;;  %v179_v46 = vld [vmem:[%s2410_s1 + $0x4d0] sm:$0xff]  ;;  %v112_v47 = vld [vmem:[%s2410_s1 + $0x2b8] sm:$0xff] }
  0x40   :  { %300 = vmatpush2.msra.mxu0 %v93_v61  ;;  %410 = vmatpush1.msra.mxu1 %v31_v62  ;;  %v176_v48 = vld [vmem:[%s2410_s1 + $0x4b8] sm:$0xff]  ;;  %v111_v49 = vld [vmem:[%s2410_s1 + $0x2b0] sm:$0xff] }
  0x41   :  { %301 = vmatprep.subr.mxu0 %v90_v63  ;;  %411 = vmatprep.subr.mxu1 %v28_v0  ;;  %v175_v50 = vld [vmem:[%s2410_s1 + $0x4b0] sm:$0xff]  ;;  %v108_v51 = vld [vmem:[%s2410_s1 + $0x298] sm:$0xff] }
  0x42   :  { %302 = vmatpush2.msra.mxu0 %v89_v1  ;;  %303 = vmatprep.mubr.f32.mxu0 %v1571_v4  ;;  %v172_v52 = vld [vmem:[%s2410_s1 + $0x498] sm:$0xff]  ;;  %v107_v53 = vld [vmem:[%s2410_s1 + $0x290] sm:$0xff] }
  0x43   :  { %412 = vmatpush1.msra.mxu1 %v27_v5  ;;  %304 = vmatmul.mubr.f32.vlgmr.msra.gmra.mxu0 %v1579_v6  ;;  %v171_v54 = vld [vmem:[%s2410_s1 + $0x490] sm:$0xff]  ;;  %v104_v55 = vld [vmem:[%s2410_s1 + $0x278] sm:$0xff] }
  0x44   :  { %413 = vmatprep.subr.mxu1 %v152_v7  ;;  %452 = vmatprep.subr.mxu0 %v216_v8  ;;  %v168_v56 = vld [vmem:[%s2410_s1 + $0x478] sm:$0xff]  ;;  %v103_v57 = vld [vmem:[%s2410_s1 + $0x270] sm:$0xff] }
  0x45   :  { %414 = vmatpush2.msra.mxu1 %v151_v9  ;;  %453 = vmatpush1.msra.mxu0 %v215_v10  ;;  %v167_v58 = vld [vmem:[%s2410_s1 + $0x470] sm:$0xff]  ;;  %v100_v59 = vld [vmem:[%s2410_s1 + $0x258] sm:$0xff] }
  0x46   :  { %415 = vmatprep.subr.mxu1 %v148_v11  ;;  %454 = vmatprep.subr.mxu0 %v212_v12  ;;  %v164_v60 = vld [vmem:[%s2410_s1 + $0x458] sm:$0xff]  ;;  %v99_v61 = vld [vmem:[%s2410_s1 + $0x250] sm:$0xff]  ;;  %v596_v12 = vld [vmem:[%s2412_s3 + $0x168] sm:$0xff] }
  0x47   :  { %416 = vmatpush2.msra.mxu1 %v147_v13  ;;  %455 = vmatpush1.msra.mxu0 %v211_v14  ;;  %v163_v62 = vld [vmem:[%s2410_s1 + $0x450] sm:$0xff]  ;;  %v96_v63 = vld [vmem:[%s2410_s1 + $0x238] sm:$0xff]  ;;  %v587_v14 = vld [vmem:[%s2412_s3 + $0x120] sm:$0xff] }
  0x48   :  { %417 = vmatprep.subr.mxu1 %v144_v15  ;;  %456 = vmatprep.subr.mxu0 %v208_v16  ;;  %v160_v0 = vld [vmem:[%s2410_s1 + $0x438] sm:$0xff]  ;;  %v95_v1 = vld [vmem:[%s2410_s1 + $0x230] sm:$0xff]  ;;  %v584_v16 = vld [vmem:[%s2412_s3 + $0x108] sm:$0xff] }
  0x49   :  { %418 = vmatpush2.msra.mxu1 %v143_v17  ;;  %457 = vmatpush1.msra.mxu0 %v207_v18  ;;  %v159_v5 = vld [vmem:[%s2410_s1 + $0x430] sm:$0xff]  ;;  %v92_v7 = vld [vmem:[%s2410_s1 + $0x218] sm:$0xff] }
  0x4a   :  { %419 = vmatprep.subr.mxu1 %v140_v19  ;;  %458 = vmatprep.subr.mxu0 %v204_v20  ;;  %v156_v8 = vld [vmem:[%s2410_s1 + $0x418] sm:$0xff]  ;;  %v91_v9 = vld [vmem:[%s2410_s1 + $0x210] sm:$0xff]  ;;  %v579_v19 = vld [vmem:[%s2412_s3 + $0xe0] sm:$0xff] }
  0x4b   :  { %420 = vmatpush2.msra.mxu1 %v139_v21  ;;  %459 = vmatpush1.msra.mxu0 %v203_v22  ;;  %v155_v10 = vld [vmem:[%s2410_s1 + $0x410] sm:$0xff]  ;;  %v594_v13 = vld [vmem:[%s2412_s3 + $0x158] sm:$0xff]  ;;  %v576_v21 = vld [vmem:[%s2412_s3 + $0xc8] sm:$0xff] }
  0x4c   :  { %421 = vmatprep.subr.mxu1 %v136_v23  ;;  %460 = vmatprep.subr.mxu0 %v200_v24  ;;  %v597_v11 = vld [vmem:[%s2412_s3 + $0x170] sm:$0xff]  ;;  %v582_v17 = vld [vmem:[%s2412_s3 + $0xf8] sm:$0xff]  ;;  %v575_v22 = vld [vmem:[%s2412_s3 + $0xc0] sm:$0xff] }
  0x4d   :  { %422 = vmatpush2.msra.mxu1 %v135_v25  ;;  %461 = vmatpush1.msra.mxu0 %v199_v26  ;;  %v585_v15 = vld [vmem:[%s2412_s3 + $0x110] sm:$0xff]  ;;  %v578_v20 = vld [vmem:[%s2412_s3 + $0xd8] sm:$0xff]  ;;  %v572_v24 = vld [vmem:[%s2412_s3 + $0xa8] sm:$0xff] }
  0x4e   :  { %423 = vmatprep.subr.mxu1 %v132_v27  ;;  %462 = vmatprep.subr.mxu0 %v196_v28  ;;  %v581_v18 = vld [vmem:[%s2412_s3 + $0xf0] sm:$0xff]  ;;  %v570_v25 = vld [vmem:[%s2412_s3 + $0x98] sm:$0xff]  ;;  %v567_v27 = vld [vmem:[%s2412_s3 + $0x80] sm:$0xff] }
  0x4f   :  { %424 = vmatpush2.msra.mxu1 %v131_v29  ;;  %463 = vmatpush1.msra.mxu0 %v195_v30  ;;  %v573_v23 = vld [vmem:[%s2412_s3 + $0xb0] sm:$0xff]  ;;  %v566_v28 = vld [vmem:[%s2412_s3 + $0x78] sm:$0xff]  ;;  %v564_v29 = vld [vmem:[%s2412_s3 + $0x68] sm:$0xff] }
  0x50   :  { %425 = vmatprep.subr.mxu1 %v128_v31  ;;  %464 = vmatprep.subr.mxu0 %v192_v32  ;;  %v569_v26 = vld [vmem:[%s2412_s3 + $0x90] sm:$0xff]  ;;  %v563_v30 = vld [vmem:[%s2412_s3 + $0x60] sm:$0xff]  ;;  %v560_v32 = vld [vmem:[%s2412_s3 + $0x48] sm:$0xff] }
  0x51   :  { %426 = vmatpush2.msra.mxu1 %v127_v33  ;;  %465 = vmatpush1.msra.mxu0 %v191_v34  ;;  %v561_v31 = vld [vmem:[%s2412_s3 + $0x50] sm:$0xff]  ;;  %v558_v33 = vld [vmem:[%s2412_s3 + $0x38] sm:$0xff] }
  0x52   :  { %427 = vmatprep.subr.mxu1 %v124_v35  ;;  %466 = vmatprep.subr.mxu0 %v188_v36  ;;  %v557_v34 = vld [vmem:[%s2412_s3 + $0x30] sm:$0xff]  ;;  %v555_v35 = vld [vmem:[%s2412_s3 + $0x20] sm:$0xff]  ;;  %v554_v36 = vld [vmem:[%s2412_s3 + $0x18] sm:$0xff] }
  0x53   :  { %428 = vmatpush2.msra.mxu1 %v123_v37  ;;  %467 = vmatpush1.msra.mxu0 %v187_v38  ;;  %v552_v37 = vld [vmem:[%s2412_s3 + $0x8] sm:$0xff]  ;;  %v551_v38 = vld [vmem:[%s2412_s3] sm:$0xff] }
  0x54   :  { %429 = vmatprep.subr.mxu1 %v120_v39  ;;  %468 = vmatprep.subr.mxu0 %v184_v40  ;;  %v645_v39 = vld [vmem:[%s2412_s3 + $0x2f0] sm:$0xff] }
  0x55   :  { %430 = vmatpush2.msra.mxu1 %v119_v41  ;;  %469 = vmatpush1.msra.mxu0 %v183_v42  ;;  %v693_v40 = vld [vmem:[%s2412_s3 + $0x470] sm:$0xff]  ;;  %v644_v41 = vld [vmem:[%s2412_s3 + $0x2e8] sm:$0xff] }
  0x56   :  { %431 = vmatprep.subr.mxu1 %v116_v43  ;;  %470 = vmatprep.subr.mxu0 %v180_v44  ;;  %v692_v42 = vld [vmem:[%s2412_s3 + $0x468] sm:$0xff]  ;;  %v642_v43 = vld [vmem:[%s2412_s3 + $0x2d8] sm:$0xff] }
  0x57   :  { %432 = vmatpush2.msra.mxu1 %v115_v45  ;;  %471 = vmatpush1.msra.mxu0 %v179_v46  ;;  %v690_v44 = vld [vmem:[%s2412_s3 + $0x458] sm:$0xff]  ;;  %v641_v45 = vld [vmem:[%s2412_s3 + $0x2d0] sm:$0xff] }
  0x58   :  { %433 = vmatprep.subr.mxu1 %v112_v47  ;;  %472 = vmatprep.subr.mxu0 %v176_v48  ;;  %v689_v46 = vld [vmem:[%s2412_s3 + $0x450] sm:$0xff]  ;;  %v639_v47 = vld [vmem:[%s2412_s3 + $0x2c0] sm:$0xff] }
  0x59   :  { %434 = vmatpush2.msra.mxu1 %v111_v49  ;;  %473 = vmatpush1.msra.mxu0 %v175_v50  ;;  %v687_v48 = vld [vmem:[%s2412_s3 + $0x440] sm:$0xff]  ;;  %v638_v49 = vld [vmem:[%s2412_s3 + $0x2b8] sm:$0xff] }
  0x5a   :  { %435 = vmatprep.subr.mxu1 %v108_v51  ;;  %474 = vmatprep.subr.mxu0 %v172_v52  ;;  %v686_v50 = vld [vmem:[%s2412_s3 + $0x438] sm:$0xff]  ;;  %v636_v51 = vld [vmem:[%s2412_s3 + $0x2a8] sm:$0xff] }
  0x5b   :  { %436 = vmatpush2.msra.mxu1 %v107_v53  ;;  %475 = vmatpush1.msra.mxu0 %v171_v54  ;;  %v684_v52 = vld [vmem:[%s2412_s3 + $0x428] sm:$0xff]  ;;  %v635_v53 = vld [vmem:[%s2412_s3 + $0x2a0] sm:$0xff] }
  0x5c   :  { %437 = vmatprep.subr.mxu1 %v104_v55  ;;  %476 = vmatprep.subr.mxu0 %v168_v56  ;;  %v683_v54 = vld [vmem:[%s2412_s3 + $0x420] sm:$0xff]  ;;  %v633_v55 = vld [vmem:[%s2412_s3 + $0x290] sm:$0xff] }
  0x5d   :  { %438 = vmatpush2.msra.mxu1 %v103_v57  ;;  %477 = vmatpush1.msra.mxu0 %v167_v58  ;;  %v681_v56 = vld [vmem:[%s2412_s3 + $0x410] sm:$0xff]  ;;  %v632_v57 = vld [vmem:[%s2412_s3 + $0x288] sm:$0xff] }
  0x5e   :  { %439 = vmatprep.subr.mxu1 %v100_v59  ;;  %478 = vmatprep.subr.mxu0 %v164_v60  ;;  %v680_v58 = vld [vmem:[%s2412_s3 + $0x408] sm:$0xff]  ;;  %v630_v59 = vld [vmem:[%s2412_s3 + $0x278] sm:$0xff] }
  0x5f   :  { %440 = vmatpush2.msra.mxu1 %v99_v61  ;;  %479 = vmatpush1.msra.mxu0 %v163_v62  ;;  %v678_v60 = vld [vmem:[%s2412_s3 + $0x3f8] sm:$0xff]  ;;  %v629_v61 = vld [vmem:[%s2412_s3 + $0x270] sm:$0xff] }
  0x60   :  { %441 = vmatprep.subr.mxu1 %v96_v63  ;;  %480 = vmatprep.subr.mxu0 %v160_v0  ;;  %v677_v62 = vld [vmem:[%s2412_s3 + $0x3f0] sm:$0xff]  ;;  %v627_v63 = vld [vmem:[%s2412_s3 + $0x260] sm:$0xff] }
  0x61   :  { %442 = vmatpush2.msra.mxu1 %v95_v1  ;;  %481 = vmatpush1.msra.mxu0 %v159_v5  ;;  %v675_v0 = vld [vmem:[%s2412_s3 + $0x3e0] sm:$0xff]  ;;  %v626_v1 = vld [vmem:[%s2412_s3 + $0x258] sm:$0xff] }
  0x62   :  { %443 = vmatprep.subr.mxu1 %v92_v7  ;;  %482 = vmatprep.subr.mxu0 %v156_v8  ;;  %v674_v5 = vld [vmem:[%s2412_s3 + $0x3d8] sm:$0xff]  ;;  %v624_v7 = vld [vmem:[%s2412_s3 + $0x248] sm:$0xff] }
  0x63   :  { %444 = vmatpush2.msra.mxu1 %v91_v9  ;;  %445 = vmatprep.mubr.f32.mxu1 %v1571_v4  ;;  %v590_v4 = vld [vmem:[%s2412_s3 + $0x138] sm:$0xff]  ;;  %v672_v8 = vld [vmem:[%s2412_s3 + $0x3c8] sm:$0xff]  ;;  %v623_v9 = vld [vmem:[%s2412_s3 + $0x240] sm:$0xff] }
  0x64   :  { %483 = vmatpush1.msra.mxu0 %v155_v10  ;;  %516 = vmatprep.mubr.f32.mxu0 %v1144_v3  ;;  %v593_v3 = vld [vmem:[%s2412_s3 + $0x150] sm:$0xff]  ;;  %v671_v10 = vld [vmem:[%s2412_s3 + $0x3c0] sm:$0xff] }
  0x65   :  { %446 = vmatmul.mubr.f32.vlgmr.msra.gmra.mxu1 %v1579_v6  ;;  %517 = vmatmul.mubr.f32.vlgmr.msra.gmra.mxu0 %v1379_v2  ;;  %v591_v2 = vld [vmem:[%s2412_s3 + $0x140] sm:$0xff]  ;;  %v588_v6 = vld [vmem:[%s2412_s3 + $0x128] sm:$0xff] }
  0x66   :  { %760 = vmatprep.subr.mxu0 %v597_v11  ;;  %831 = vmatprep.subr.mxu1 %v693_v40  ;;  %v621_v11 = vld [vmem:[%s2412_s3 + $0x230] sm:$0xff]  ;;  %v646_v40 = vld [vmem:[%s2412_s3 + $0x2f8] sm:$0xff] }
  0x67   :  { %761 = vmatpush1.msra.mxu0 %v596_v12  ;;  %832 = vmatpush1.msra.mxu1 %v692_v42  ;;  %v669_v12 = vld [vmem:[%s2412_s3 + $0x3b0] sm:$0xff]  ;;  %v738_v42 = vld [vmem:[%s2412_s3 + $0x5d8] sm:$0xff] }
  0x68   :  { %762 = vmatprep.subr.mxu0 %v594_v13  ;;  %833 = vmatprep.subr.mxu1 %v690_v44  ;;  %v620_v13 = vld [vmem:[%s2412_s3 + $0x228] sm:$0xff]  ;;  %v735_v44 = vld [vmem:[%s2412_s3 + $0x5c0] sm:$0xff] }
  0x69   :  { %763 = vmatpush1.msra.mxu0 %v593_v3  ;;  %834 = vmatpush1.msra.mxu1 %v689_v46  ;;  %v668_v3 = vld [vmem:[%s2412_s3 + $0x3a8] sm:$0xff] }
  0x6a   :  { %764 = vmatprep.subr.mxu0 %v591_v2  ;;  %835 = vmatprep.subr.mxu1 %v687_v48  ;;  %v618_v2 = vld [vmem:[%s2412_s3 + $0x218] sm:$0xff]  ;;  %v732_v46 = vld [vmem:[%s2412_s3 + $0x5a8] sm:$0xff]  ;;  %v729_v48 = vld [vmem:[%s2412_s3 + $0x590] sm:$0xff] }
  0x6b   :  { %765 = vmatpush1.msra.mxu0 %v590_v4  ;;  %836 = vmatpush1.msra.mxu1 %v686_v50  ;;  %v666_v4 = vld [vmem:[%s2412_s3 + $0x398] sm:$0xff] }
  0x6c   :  { %766 = vmatprep.subr.mxu0 %v588_v6  ;;  %837 = vmatprep.subr.mxu1 %v684_v52  ;;  %v617_v6 = vld [vmem:[%s2412_s3 + $0x210] sm:$0xff]  ;;  %v726_v50 = vld [vmem:[%s2412_s3 + $0x578] sm:$0xff]  ;;  %v723_v52 = vld [vmem:[%s2412_s3 + $0x560] sm:$0xff] }
  0x6d   :  { %767 = vmatpush1.msra.mxu0 %v587_v14  ;;  %838 = vmatpush1.msra.mxu1 %v683_v54  ;;  %v665_v14 = vld [vmem:[%s2412_s3 + $0x390] sm:$0xff]  ;;  %v720_v54 = vld [vmem:[%s2412_s3 + $0x548] sm:$0xff] }
  0x6e   :  { %768 = vmatprep.subr.mxu0 %v585_v15  ;;  %839 = vmatprep.subr.mxu1 %v681_v56  ;;  %v615_v15 = vld [vmem:[%s2412_s3 + $0x200] sm:$0xff]  ;;  %v717_v56 = vld [vmem:[%s2412_s3 + $0x530] sm:$0xff] }
  0x6f   :  { %769 = vmatpush1.msra.mxu0 %v584_v16  ;;  %840 = vmatpush1.msra.mxu1 %v680_v58  ;;  %v663_v16 = vld [vmem:[%s2412_s3 + $0x380] sm:$0xff]  ;;  %v714_v58 = vld [vmem:[%s2412_s3 + $0x518] sm:$0xff] }
  0x70   :  { %770 = vmatprep.subr.mxu0 %v582_v17  ;;  %841 = vmatprep.subr.mxu1 %v678_v60  ;;  %v614_v17 = vld [vmem:[%s2412_s3 + $0x1f8] sm:$0xff]  ;;  %v711_v60 = vld [vmem:[%s2412_s3 + $0x500] sm:$0xff] }
  0x71   :  { %771 = vmatpush1.msra.mxu0 %v581_v18  ;;  %842 = vmatpush1.msra.mxu1 %v677_v62  ;;  %v662_v18 = vld [vmem:[%s2412_s3 + $0x378] sm:$0xff]  ;;  %v708_v62 = vld [vmem:[%s2412_s3 + $0x4e8] sm:$0xff] }
  0x72   :  { %772 = vmatprep.subr.mxu0 %v579_v19  ;;  %843 = vmatprep.subr.mxu1 %v675_v0  ;;  %v612_v19 = vld [vmem:[%s2412_s3 + $0x1e8] sm:$0xff]  ;;  %v705_v0 = vld [vmem:[%s2412_s3 + $0x4d0] sm:$0xff] }
  0x73   :  { %773 = vmatpush1.msra.mxu0 %v578_v20  ;;  %844 = vmatpush1.msra.mxu1 %v674_v5  ;;  %v660_v20 = vld [vmem:[%s2412_s3 + $0x368] sm:$0xff]  ;;  %v702_v5 = vld [vmem:[%s2412_s3 + $0x4b8] sm:$0xff] }
  0x74   :  { %774 = vmatprep.subr.mxu0 %v576_v21  ;;  %845 = vmatprep.subr.mxu1 %v672_v8  ;;  %v611_v21 = vld [vmem:[%s2412_s3 + $0x1e0] sm:$0xff] }
  0x75   :  { %775 = vmatpush1.msra.mxu0 %v575_v22  ;;  %846 = vmatpush1.msra.mxu1 %v671_v10  ;;  %v659_v22 = vld [vmem:[%s2412_s3 + $0x360] sm:$0xff]  ;;  %v696_v10 = vld [vmem:[%s2412_s3 + $0x488] sm:$0xff] }
  0x76   :  { %776 = vmatprep.subr.mxu0 %v573_v23  ;;  %847 = vmatprep.subr.mxu1 %v669_v12  ;;  %v609_v23 = vld [vmem:[%s2412_s3 + $0x1d0] sm:$0xff]  ;;  %v699_v8 = vld [vmem:[%s2412_s3 + $0x4a0] sm:$0xff]  ;;  %v742_v12 = vld [vmem:[%s2412_s3 + $0x5f8] sm:$0xff] }
  0x77   :  { %777 = vmatpush1.msra.mxu0 %v572_v24  ;;  %848 = vmatpush1.msra.mxu1 %v668_v3  ;;  %v657_v24 = vld [vmem:[%s2412_s3 + $0x350] sm:$0xff] }
  0x78   :  { %778 = vmatprep.subr.mxu0 %v570_v25  ;;  %849 = vmatprep.subr.mxu1 %v666_v4  ;;  %v608_v25 = vld [vmem:[%s2412_s3 + $0x1c8] sm:$0xff]  ;;  %v217_v4 = vld [vmem:[%s2413_s2] sm:$0xf] }
  0x79   :  { %779 = vmatpush1.msra.mxu0 %v569_v26  ;;  %850 = vmatpush1.msra.mxu1 %v665_v14  ;;  %v656_v26 = vld [vmem:[%s2412_s3 + $0x348] sm:$0xff] }
  0x7a   :  { %780 = vmatprep.subr.mxu0 %v567_v27  ;;  %851 = vmatprep.subr.mxu1 %v663_v16  ;;  %v606_v27 = vld [vmem:[%s2412_s3 + $0x1b8] sm:$0xff] }
  0x7b   :  { %781 = vmatpush1.msra.mxu0 %v566_v28  ;;  %852 = vmatpush1.msra.mxu1 %v662_v18  ;;  %v654_v28 = vld [vmem:[%s2412_s3 + $0x338] sm:$0xff] }
  0x7c   :  { %782 = vmatprep.subr.mxu0 %v564_v29  ;;  %853 = vmatprep.subr.mxu1 %v660_v20  ;;  %v605_v29 = vld [vmem:[%s2412_s3 + $0x1b0] sm:$0xff] }
  0x7d   :  { %783 = vmatpush1.msra.mxu0 %v563_v30  ;;  %854 = vmatpush1.msra.mxu1 %v659_v22  ;;  %v653_v30 = vld [vmem:[%s2412_s3 + $0x330] sm:$0xff] }
  0x7e   :  { %784 = vmatprep.subr.mxu0 %v561_v31  ;;  %855 = vmatprep.subr.mxu1 %v657_v24  ;;  %v603_v31 = vld [vmem:[%s2412_s3 + $0x1a0] sm:$0xff] }
  0x7f   :  { %785 = vmatpush1.msra.mxu0 %v560_v32  ;;  %856 = vmatpush1.msra.mxu1 %v656_v26  ;;  %v651_v32 = vld [vmem:[%s2412_s3 + $0x320] sm:$0xff] }
  0x80   :  { %786 = vmatprep.subr.mxu0 %v558_v33  ;;  %857 = vmatprep.subr.mxu1 %v654_v28  ;;  %v602_v33 = vld [vmem:[%s2412_s3 + $0x198] sm:$0xff] }
  0x81   :  { %787 = vmatpush1.msra.mxu0 %v557_v34  ;;  %858 = vmatpush1.msra.mxu1 %v653_v30  ;;  %v650_v34 = vld [vmem:[%s2412_s3 + $0x318] sm:$0xff] }
  0x82   :  { %788 = vmatprep.subr.mxu0 %v555_v35  ;;  %859 = vmatprep.subr.mxu1 %v651_v32  ;;  %v600_v35 = vld [vmem:[%s2412_s3 + $0x188] sm:$0xff] }
  0x83   :  { %789 = vmatpush1.msra.mxu0 %v554_v36  ;;  %860 = vmatpush1.msra.mxu1 %v650_v34  ;;  %v648_v36 = vld [vmem:[%s2412_s3 + $0x308] sm:$0xff] }
  0x84   :  { %790 = vmatprep.subr.mxu0 %v552_v37  ;;  %861 = vmatprep.subr.mxu1 %v648_v36  ;;  %v599_v37 = vld [vmem:[%s2412_s3 + $0x180] sm:$0xff] }
  0x85   :  { %791 = vmatpush1.msra.mxu0 %v551_v38  ;;  %v647_v38 = vld [vmem:[%s2412_s3 + $0x300] sm:$0xff] }
  0x86   :  { %792 = vmatprep.subr.mxu0 %v645_v39  ;;  %862 = vmatpush1.msra.mxu1 %v647_v38  ;;  %v741_v39 = vld [vmem:[%s2412_s3 + $0x5f0] sm:$0xff] }
  0x87   :  { %793 = vmatpush2.msra.mxu0 %v644_v41  ;;  %863 = vmatprep.subr.mxu1 %v741_v39  ;;  %v740_v41 = vld [vmem:[%s2412_s3 + $0x5e8] sm:$0xff] }
  0x88   :  { %794 = vmatprep.subr.mxu0 %v642_v43  ;;  %864 = vmatpush2.msra.mxu1 %v740_v41  ;;  %v737_v43 = vld [vmem:[%s2412_s3 + $0x5d0] sm:$0xff] }
  0x89   :  { %795 = vmatpush2.msra.mxu0 %v641_v45  ;;  %865 = vmatprep.subr.mxu1 %v738_v42  ;;  %v734_v45 = vld [vmem:[%s2412_s3 + $0x5b8] sm:$0xff] }
  0x8a   :  { %796 = vmatprep.subr.mxu0 %v639_v47  ;;  %866 = vmatpush2.msra.mxu1 %v737_v43  ;;  %v731_v47 = vld [vmem:[%s2412_s3 + $0x5a0] sm:$0xff] }
  0x8b   :  { %797 = vmatpush2.msra.mxu0 %v638_v49  ;;  %867 = vmatprep.subr.mxu1 %v735_v44  ;;  %v728_v49 = vld [vmem:[%s2412_s3 + $0x588] sm:$0xff] }
  0x8c   :  { %798 = vmatprep.subr.mxu0 %v636_v51  ;;  %868 = vmatpush2.msra.mxu1 %v734_v45  ;;  %v725_v51 = vld [vmem:[%s2412_s3 + $0x570] sm:$0xff]  ;;  %v598_v45 = vld [vmem:[%s2412_s3 + $0x178] sm:$0xff] }
  0x8d   :  { %799 = vmatpush2.msra.mxu0 %v635_v53  ;;  %869 = vmatprep.subr.mxu1 %v732_v46  ;;  %v722_v53 = vld [vmem:[%s2412_s3 + $0x558] sm:$0xff]  ;;  %v643_v46 = vld [vmem:[%s2412_s3 + $0x2e0] sm:$0xff] }
  0x8e   :  { %800 = vmatprep.subr.mxu0 %v633_v55  ;;  %870 = vmatpush2.msra.mxu1 %v731_v47  ;;  %v719_v55 = vld [vmem:[%s2412_s3 + $0x540] sm:$0xff] }
  0x8f   :  { %801 = vmatpush2.msra.mxu0 %v632_v57  ;;  %871 = vmatprep.subr.mxu1 %v729_v48  ;;  %v716_v57 = vld [vmem:[%s2412_s3 + $0x528] sm:$0xff]  ;;  %v595_v48 = vld [vmem:[%s2412_s3 + $0x160] sm:$0xff] }
  0x90   :  { %802 = vmatprep.subr.mxu0 %v630_v59  ;;  %872 = vmatpush2.msra.mxu1 %v728_v49  ;;  %v713_v59 = vld [vmem:[%s2412_s3 + $0x510] sm:$0xff]  ;;  %v640_v49 = vld [vmem:[%s2412_s3 + $0x2c8] sm:$0xff] }
  0x91   :  { %803 = vmatpush2.msra.mxu0 %v629_v61  ;;  %873 = vmatprep.subr.mxu1 %v726_v50  ;;  %v710_v61 = vld [vmem:[%s2412_s3 + $0x4f8] sm:$0xff]  ;;  %v592_v50 = vld [vmem:[%s2412_s3 + $0x148] sm:$0xff] }
  0x92   :  { %804 = vmatprep.subr.mxu0 %v627_v63  ;;  %874 = vmatpush2.msra.mxu1 %v725_v51  ;;  %v707_v63 = vld [vmem:[%s2412_s3 + $0x4e0] sm:$0xff]  ;;  %v637_v51 = vld [vmem:[%s2412_s3 + $0x2b0] sm:$0xff] }
  0x93   :  { %805 = vmatpush2.msra.mxu0 %v626_v1  ;;  %875 = vmatprep.subr.mxu1 %v723_v52  ;;  %v704_v1 = vld [vmem:[%s2412_s3 + $0x4c8] sm:$0xff]  ;;  %v589_v52 = vld [vmem:[%s2412_s3 + $0x130] sm:$0xff] }
  0x94   :  { %806 = vmatprep.subr.mxu0 %v624_v7  ;;  %876 = vmatpush2.msra.mxu1 %v722_v53  ;;  %v701_v7 = vld [vmem:[%s2412_s3 + $0x4b0] sm:$0xff]  ;;  %v634_v53 = vld [vmem:[%s2412_s3 + $0x298] sm:$0xff] }
  0x95   :  { %807 = vmatpush2.msra.mxu0 %v623_v9  ;;  %877 = vmatprep.subr.mxu1 %v720_v54  ;;  %v698_v9 = vld [vmem:[%s2412_s3 + $0x498] sm:$0xff] }
  0x96   :  { %808 = vmatprep.subr.mxu0 %v621_v11  ;;  %878 = vmatpush2.msra.mxu1 %v719_v55  ;;  %v695_v11 = vld [vmem:[%s2412_s3 + $0x480] sm:$0xff]  ;;  %v586_v54 = vld [vmem:[%s2412_s3 + $0x118] sm:$0xff] }
  0x97   :  { %809 = vmatpush2.msra.mxu0 %v620_v13  ;;  %879 = vmatprep.subr.mxu1 %v717_v56  ;;  %v219_v13 = vlaneseq  ;;  %v631_v55 = vld [vmem:[%s2412_s3 + $0x280] sm:$0xff] }
  0x98   :  { %810 = vmatprep.subr.mxu0 %v618_v2  ;;  %880 = vmatpush2.msra.mxu1 %v716_v57  ;;  %v583_v56 = vld [vmem:[%s2412_s3 + $0x100] sm:$0xff]  ;;  %v628_v57 = vld [vmem:[%s2412_s3 + $0x268] sm:$0xff] }
  0x99   :  { %811 = vmatpush2.msra.mxu0 %v617_v6  ;;  %881 = vmatprep.subr.mxu1 %v714_v58  ;;  %v2169_v3 = vshrl.u32 %v219_v13, 7  ;;  %v580_v58 = vld [vmem:[%s2412_s3 + $0xe8] sm:$0xff]  ;;  %v610_v13 = vld [vmem:[%s2412_s3 + $0x1d8] sm:$0xff] }
  0x9a   :  { %812 = vmatprep.subr.mxu0 %v615_v15  ;;  %882 = vmatpush2.msra.mxu1 %v713_v59  ;;  %v625_v59 = vld [vmem:[%s2412_s3 + $0x250] sm:$0xff] }
  0x9b   :  { %813 = vmatpush2.msra.mxu0 %v614_v17  ;;  %883 = vmatprep.subr.mxu1 %v711_v60  ;;  %v221_v2 = vsub.s32 0, %v2169_v3  ;;  %v225_v6 = vsub.s32 1, %v2169_v3  ;;  %v229_v30 = vsub.s32 2, %v2169_v3  ;;  %v577_v60 = vld [vmem:[%s2412_s3 + $0xd0] sm:$0xff] }
  0x9c   :  { %814 = vmatprep.subr.mxu0 %v612_v19  ;;  %884 = vmatpush2.msra.mxu1 %v710_v61 }
  0x9d   :  { %815 = vmatpush2.msra.mxu0 %v611_v21  ;;  %885 = vmatprep.subr.mxu1 %v708_v62  ;;  %v222_v14 = vrot.slane %v217_v4, %v221_v2  ;;  %v226_v15 = vrot.slane %v217_v4, %v225_v6  ;;  %v230_v32 = vrot.slane %v217_v4, %v229_v30  ;;  %v622_v62 = vld [vmem:[%s2412_s3 + $0x238] sm:$0xff] }
  0x9e   :  { %816 = vmatprep.subr.mxu0 %v609_v23  ;;  %886 = vmatpush2.msra.mxu1 %v707_v63 }
  0x9f   :  { %817 = vmatpush2.msra.mxu0 %v608_v25  ;;  %887 = vmatprep.subr.mxu1 %v705_v0  ;;  %v574_v0 = vld [vmem:[%s2412_s3 + $0xb8] sm:$0xff] }
  0xa0   :  { %818 = vmatprep.subr.mxu0 %v606_v27  ;;  %888 = vmatpush2.msra.mxu1 %v704_v1 }
  0xa1   :  { %819 = vmatpush2.msra.mxu0 %v605_v29  ;;  %889 = vmatprep.subr.mxu1 %v702_v5  ;;  %v619_v5 = vld [vmem:[%s2412_s3 + $0x220] sm:$0xff] }
  0xa2   :  { %820 = vmatprep.subr.mxu0 %v603_v31  ;;  %890 = vmatpush2.msra.mxu1 %v701_v7  ;;  %v233_v31 = vsub.s32 3, %v2169_v3 }
  0xa3   :  { %821 = vmatpush2.msra.mxu0 %v602_v33  ;;  %891 = vmatprep.subr.mxu1 %v699_v8  ;;  %v571_v8 = vld [vmem:[%s2412_s3 + $0xa0] sm:$0xff] }
  0xa4   :  { %822 = vmatprep.subr.mxu0 %v600_v35  ;;  %892 = vmatpush2.msra.mxu1 %v698_v9  ;;  %v234_v33 = vrot.slane %v217_v4, %v233_v31  ;;  %v616_v9 = vld [vmem:[%s2412_s3 + $0x208] sm:$0xff]  ;;  %v562_v4 = vld [vmem:[%s2412_s3 + $0x58] sm:$0xff] }
  0xa5   :  { %823 = vmatpush2.msra.mxu0 %v599_v37  ;;  %893 = vmatprep.subr.mxu1 %v696_v10  ;;  %v568_v10 = vld [vmem:[%s2412_s3 + $0x88] sm:$0xff]  ;;  %v682_v31 = vld [vmem:[%s2412_s3 + $0x418] sm:$0xff] }
  0xa6   :  { %1057 = vmatprep.subr.mxu0 %v646_v40  ;;  %894 = vmatpush2.msra.mxu1 %v695_v11  ;;  %v613_v11 = vld [vmem:[%s2412_s3 + $0x1f0] sm:$0xff] }
  0xa7   :  { %1092 = vmatprep.subr.mxu1 %v742_v12  ;;  %v565_v12 = vld [vmem:[%s2412_s3 + $0x70] sm:$0xff] }
  0xe3   :  { %v376_v16 = vpop.f32.mrf.mxu1 }
  0xe5   :  { %v378_v22 = vpop.f32.mrf.mxu1 }
 0x103   :  { %v305_v17 = vpop.f32.mrf.mxu0 }
 0x104   :  { %v306_v18 = vadd.f32 %v305_v17, %v222_v14  ;;  %v607_v14 = vld [vmem:[%s2412_s3 + $0x1c0] sm:$0xff]  ;;  %v556_v17 = vld [vmem:[%s2412_s3 + $0x28] sm:$0xff] }
 0x105   :  { %v307_v19 = vpop.f32.mrf.mxu0 }
 0x106   :  { %v377_v20 = vadd.f32 %v376_v16, %v306_v18  ;;  %v308_v21 = vadd.f32 %v307_v19, %v226_v15  ;;  %v559_v15 = vld [vmem:[%s2412_s3 + $0x40] sm:$0xff]  ;;  %v604_v16 = vld [vmem:[%s2412_s3 + $0x1a8] sm:$0xff]  ;;  %v601_v18 = vld [vmem:[%s2412_s3 + $0x190] sm:$0xff] }
 0x107   :  { %v553_v19 = vld [vmem:[%s2412_s3 + $0x10] sm:$0xff] }
 0x108   :  { %v1053_v23 = vmul.f32 -1.442695, %v377_v20  ;;  %v379_v24 = vadd.f32 %v378_v22, %v308_v21  ;;  %v694_v22 = vld [vmem:[%s2412_s3 + $0x478] sm:$0xff] }
 0x10a   :  { %1128 = vpow2.f32 %v1053_v23  ;;  %v1054_v25 = vmul.f32 -1.442695, %v379_v24  ;;  %v739_v23 = vld [vmem:[%s2412_s3 + $0x5e0] sm:$0xff] }
 0x10b   :  { %v691_v24 = vld [vmem:[%s2412_s3 + $0x460] sm:$0xff] }
 0x10c   :  { %1130 = vpow2.f32 %v1054_v25  ;;  %v736_v25 = vld [vmem:[%s2412_s3 + $0x5c8] sm:$0xff] }
 0x117   :  { %v1129_v26 = vpop.eup %1128 }
 0x118   :  { %v535_v27 = vadd.f32 1.0, %v1129_v26  ;;  %v688_v26 = vld [vmem:[%s2412_s3 + $0x448] sm:$0xff] }
 0x119   :  { %v1131_v28 = vpop.eup %1130 }
 0x11a   :  { %1132 = vrcp.f32 %v535_v27  ;;  %v536_v29 = vadd.f32 1.0, %v1131_v28  ;;  %v733_v27 = vld [vmem:[%s2412_s3 + $0x5b0] sm:$0xff] }
 0x11b   :  { %v685_v28 = vld [vmem:[%s2412_s3 + $0x430] sm:$0xff] }
 0x11c   :  { %1134 = vrcp.f32 %v536_v29  ;;  %v730_v29 = vld [vmem:[%s2412_s3 + $0x598] sm:$0xff] }
 0x125   :  { %v447_v34 = vpop.f32.mrf.mxu1  ;;  %v518_v36 = vpop.f32.mrf.mxu0 }
 0x126   :  { %v448_v35 = vadd.f32 %v447_v34, %v230_v32  ;;  %v727_v32 = vld [vmem:[%s2412_s3 + $0x580] sm:$0xff]  ;;  %v724_v34 = vld [vmem:[%s2412_s3 + $0x568] sm:$0xff] }
 0x127   :  { %v449_v37 = vpop.f32.mrf.mxu1  ;;  %v2184_v38 = vpop.eup %1132 }
 0x128   :  { %v519_v39 = vadd.f32 %v518_v36, %v448_v35  ;;  %v450_v40 = vadd.f32 %v449_v37, %v234_v33  ;;  %547 = vst [vmem:[%s2414_s6] sm:$0xff] %v2184_v38  ;;  %v520_v41 = vpop.f32.mrf.mxu0  ;;  %v679_v33 = vld [vmem:[%s2412_s3 + $0x400] sm:$0xff]  ;;  %v676_v35 = vld [vmem:[%s2412_s3 + $0x3e8] sm:$0xff]  ;;  %v721_v36 = vld [vmem:[%s2412_s3 + $0x550] sm:$0xff] }
 0x129   :  { %v1135_v42 = vpop.eup %1134  ;;  %v673_v37 = vld [vmem:[%s2412_s3 + $0x3d0] sm:$0xff] }
 0x12a   :  { %v1055_v43 = vmul.f32 -1.442695, %v519_v39  ;;  %v521_v44 = vadd.f32 %v520_v41, %v450_v40  ;;  %548 = vst [vmem:[%s2414_s6 + $0x8] sm:$0xff] %v1135_v42  ;;  %824 = vmatprep.mubr.f32.mxu0 %v1135_v42  ;;  %v670_v39 = vld [vmem:[%s2412_s3 + $0x3b8] sm:$0xff]  ;;  %v715_v40 = vld [vmem:[%s2412_s3 + $0x520] sm:$0xff] }
 0x12b   :  { %825 = vmatmul.mubr.f32.vlgmr.msra.gmra.mxu0 %v2184_v38  ;;  %v667_v41 = vld [vmem:[%s2412_s3 + $0x3a0] sm:$0xff] }
 0x12c   :  { %1136 = vpow2.f32 %v1055_v43  ;;  %v1056_v47 = vmul.f32 -1.442695, %v521_v44  ;;  %1058 = vmatpush3.msra.mxu0 %v598_v45  ;;  %966 = vmatprep.mubr.f32.mxu0 %v1135_v42  ;;  %v712_v42 = vld [vmem:[%s2412_s3 + $0x508] sm:$0xff]  ;;  %v709_v44 = vld [vmem:[%s2412_s3 + $0x4f0] sm:$0xff] }
 0x12d   :  { %1059 = vmatprep.subr.mxu0 %v643_v46  ;;  %v664_v43 = vld [vmem:[%s2412_s3 + $0x388] sm:$0xff]  ;;  %v661_v45 = vld [vmem:[%s2412_s3 + $0x370] sm:$0xff]  ;;  %v706_v46 = vld [vmem:[%s2412_s3 + $0x4d8] sm:$0xff] }
 0x12e   :  { %1138 = vpow2.f32 %v1056_v47  ;;  %1060 = vmatpush3.msra.mxu0 %v595_v48  ;;  %v658_v47 = vld [vmem:[%s2412_s3 + $0x358] sm:$0xff]  ;;  %v703_v48 = vld [vmem:[%s2412_s3 + $0x4c0] sm:$0xff] }
 0x12f   :  { %1061 = vmatprep.subr.mxu0 %v640_v49  ;;  %v655_v49 = vld [vmem:[%s2412_s3 + $0x340] sm:$0xff] }
 0x130   :  { %1062 = vmatpush3.msra.mxu0 %v592_v50  ;;  %v700_v50 = vld [vmem:[%s2412_s3 + $0x4a8] sm:$0xff] }
 0x131   :  { %1063 = vmatprep.subr.mxu0 %v637_v51  ;;  %v652_v51 = vld [vmem:[%s2412_s3 + $0x328] sm:$0xff] }
 0x132   :  { %1064 = vmatpush3.msra.mxu0 %v589_v52  ;;  %v697_v52 = vld [vmem:[%s2412_s3 + $0x490] sm:$0xff] }
 0x133   :  { %1065 = vmatprep.subr.mxu0 %v634_v53  ;;  %v649_v53 = vld [vmem:[%s2412_s3 + $0x310] sm:$0xff] }
 0x134   :  { %1066 = vmatpush3.msra.mxu0 %v586_v54  ;;  %v743_v54 = vld [vmem:[%s2415_s4] sm:$0x7] }
 0x135   :  { %1067 = vmatprep.subr.mxu0 %v631_v55 }
 0x136   :  { %1068 = vmatpush3.msra.mxu0 %v583_v56  ;;  %v748_v56 = vrot.slane %v743_v54, %v221_v2 }
 0x137   :  { %1069 = vmatprep.subr.mxu0 %v628_v57  ;;  %v752_v57 = vrot.slane %v743_v54, %v225_v6  ;;  %v756_v6 = vrot.slane %v743_v54, %v229_v30 }
 0x138   :  { %1070 = vmatpush3.msra.mxu0 %v580_v58 }
 0x139   :  { %v1137_v61 = vpop.eup %1136  ;;  %1071 = vmatprep.subr.mxu0 %v625_v59 }
 0x13a   :  { %v537_v63 = vadd.f32 1.0, %v1137_v61  ;;  %1072 = vmatpush3.msra.mxu0 %v577_v60 }
 0x13b   :  { %v1139_v1 = vpop.eup %1138  ;;  %1073 = vmatprep.subr.mxu0 %v622_v62 }
 0x13c   :  { %1140 = vrcp.f32 %v537_v63  ;;  %v538_v7 = vadd.f32 1.0, %v1139_v1  ;;  %1074 = vmatpush3.msra.mxu0 %v574_v0 }
 0x13d   :  { %1075 = vmatprep.subr.mxu0 %v619_v5 }
 0x13e   :  { %1142 = vrcp.f32 %v538_v7  ;;  %1076 = vmatpush3.msra.mxu0 %v571_v8 }
 0x13f   :  { %1077 = vmatprep.subr.mxu0 %v616_v9 }
 0x140   :  { %1078 = vmatpush3.msra.mxu0 %v568_v10 }
 0x141   :  { %1079 = vmatprep.subr.mxu0 %v613_v11 }
 0x142   :  { %1080 = vmatpush3.msra.mxu0 %v565_v12 }
 0x143   :  { %1081 = vmatprep.subr.mxu0 %v610_v13 }
 0x144   :  { %1082 = vmatpush3.msra.mxu0 %v562_v4 }
 0x145   :  { %1083 = vmatprep.subr.mxu0 %v607_v14 }
 0x146   :  { %1084 = vmatpush3.msra.mxu0 %v559_v15 }
 0x147   :  { %1085 = vmatprep.subr.mxu0 %v604_v16 }
 0x148   :  { %1086 = vmatpush3.msra.mxu0 %v556_v17 }
 0x149   :  { %v2287_v20 = vpop.eup %1140  ;;  %1087 = vmatprep.subr.mxu0 %v601_v18 }
 0x14a   :  { %549 = vst [vmem:[%s2414_s6 + $0x10] sm:$0xff] %v2287_v20  ;;  %1088 = vmatpush3.msra.mxu0 %v553_v19 }
 0x14b   :  { %v1143_v21 = vpop.eup %1142  ;;  %967 = vmatmul.mubr.f32.vlgmr.msra.gmra.mxu0 %v2184_v38  ;;  %v718_v38 = vld [vmem:[%s2412_s3 + $0x538] sm:$0xff] }
 0x14c   :  { %550 = vst [vmem:[%s2414_s6 + $0x18] sm:$0xff] %v1143_v21  ;;  %895 = vmatprep.mubr.f32.mxu1 %v1143_v21 }
 0x14d   :  { %896 = vmatmul.mubr.f32.vlgmr.msra.gmra.mxu1 %v2287_v20 }
 0x14e   :  { %1093 = vmatpush3.msra.mxu1 %v694_v22  ;;  %1036 = vmatprep.mubr.f32.mxu1 %v1143_v21 }
 0x14f   :  { %1094 = vmatprep.subr.mxu1 %v739_v23 }
 0x150   :  { %1095 = vmatpush3.msra.mxu1 %v691_v24 }
 0x151   :  { %1096 = vmatprep.subr.mxu1 %v736_v25 }
 0x152   :  { %1097 = vmatpush3.msra.mxu1 %v688_v26 }
 0x153   :  { %1098 = vmatprep.subr.mxu1 %v733_v27 }
 0x154   :  { %1099 = vmatpush3.msra.mxu1 %v685_v28 }
 0x155   :  { %1100 = vmatprep.subr.mxu1 %v730_v29 }
 0x156   :  { %1101 = vmatpush3.msra.mxu1 %v682_v31 }
 0x157   :  { %1102 = vmatprep.subr.mxu1 %v727_v32 }
 0x158   :  { %1103 = vmatpush3.msra.mxu1 %v679_v33 }
 0x159   :  { %1104 = vmatprep.subr.mxu1 %v724_v34 }
 0x15a   :  { %1105 = vmatpush3.msra.mxu1 %v676_v35 }
 0x15b   :  { %1106 = vmatprep.subr.mxu1 %v721_v36 }
 0x15c   :  { %1107 = vmatpush3.msra.mxu1 %v673_v37 }
 0x15d   :  { %1108 = vmatprep.subr.mxu1 %v718_v38 }
 0x15e   :  { %1109 = vmatpush3.msra.mxu1 %v670_v39 }
 0x15f   :  { %1110 = vmatprep.subr.mxu1 %v715_v40 }
 0x160   :  { %1111 = vmatpush3.msra.mxu1 %v667_v41 }
 0x161   :  { %1112 = vmatprep.subr.mxu1 %v712_v42 }
 0x162   :  { %1113 = vmatpush3.msra.mxu1 %v664_v43 }
 0x163   :  { %1114 = vmatprep.subr.mxu1 %v709_v44 }
 0x164   :  { %1115 = vmatpush3.msra.mxu1 %v661_v45 }
 0x165   :  { %1116 = vmatprep.subr.mxu1 %v706_v46 }
 0x166   :  { %1117 = vmatpush3.msra.mxu1 %v658_v47 }
 0x167   :  { %1118 = vmatprep.subr.mxu1 %v703_v48 }
 0x168   :  { %1119 = vmatpush3.msra.mxu1 %v655_v49 }
 0x169   :  { %1120 = vmatprep.subr.mxu1 %v700_v50 }
 0x16a   :  { %1121 = vmatpush3.msra.mxu1 %v652_v51 }
 0x16b   :  { %1122 = vmatprep.subr.mxu1 %v697_v52 }
 0x16c   :  { %1123 = vmatpush3.msra.mxu1 %v649_v53 }
 0x16d   :  { %1037 = vmatmul.mubr.f32.vlgmr.msra.gmra.mxu1 %v2287_v20 }
 0x1eb   :  { %v826_v55 = vpop.f32.mrf.mxu0 }
 0x1ec   :  { %v827_v59 = vadd.f32 %v826_v55, %v748_v56 }
 0x1ed   :  { %v828_v58 = vpop.f32.mrf.mxu0 }
 0x1ee   :  { %v829_v61 = vadd.f32 %v828_v58, %v752_v57 }
 0x20b   :  { %v1089_v1 = vpop.f32.mrf.mxu0 }
 0x20d   :  { %v897_v60 = vpop.f32.mrf.mxu1  ;;  %v1090_v2 = vpop.f32.mrf.mxu0 }
 0x20e   :  { %v898_v62 = vadd.f32 %v897_v60, %v827_v59  ;;  %v1091_v5 = vadd.f32 %v1090_v2, %v1089_v1 }
 0x20f   :  { %v899_v63 = vpop.f32.mrf.mxu1 }
 0x210   :  { %1042 = vst [vmem:[%s2416_s5] sm:$0xff] %v898_v62  ;;  %v900_v0 = vadd.f32 %v899_v63, %v829_v61  ;;  %v969_v9 = vadd.f32 %v1091_v5, %v756_v6 }
 0x212   :  { %1043 = vst [vmem:[%s2416_s5 + $0x8] sm:$0xff] %v900_v0 }
 0x22d   :  { %v1124_v7 = vpop.f32.mrf.mxu1 }
 0x22f   :  { %v1125_v8 = vpop.f32.mrf.mxu1 }
 0x230   :  { %v1126_v10 = vadd.f32 %v1125_v8, %v1124_v7 }
 0x232   :  { %v1039_v11 = vadd.f32 %v1126_v10, %v969_v9 }
 0x234   :  { %1044 = vst [vmem:[%s2416_s5 + $0x10] sm:$0xff] %v1039_v11 }

</bundles_post_ra>
